<compile_context>
chip_gen: v7x
topology: tpu7x:2x2x1
jax: 0.10.0
libtpu: 0.0.40
codegen_flags: <defaults>
</compile_context>

<pallas_src>
import jax
import jax.numpy as jnp
from jax.experimental import pallas as pl
from jax.experimental.pallas import tpu as pltpu

_LANE = 128


def _tlu_kernel(x_ref, tau_ref, o_ref):
    # (block_rows, block_lanes) tile max'ed against the per-row (block_rows, 1)
    # tau column; tau broadcasts along the lane axis in-register (VPU max is
    # free under the DMA on a mem-bound kernel).
    o_ref[...] = jnp.maximum(x_ref[...], tau_ref[...])


def _choose_blocks(rows, lanes, itemsize, target_block_bytes, vmem_budget_bytes,
                   megacore_min_bytes):
    """Pick (block_rows, block_lanes) for an (rows, lanes) streaming tile."""
    # Minimum sublane tile per dtype: 8 for 4-byte, 16 for 2-byte, 32 for 1-byte.
    row_align = max(8, 32 // max(1, itemsize))

    def _lane_pad(bl):
        return pl.cdiv(bl, _LANE) * _LANE

    # ---- lane (last-axis) block ------------------------------------------
    # Prefer the full extent (always legal, even when H*W % 128 != 0); otherwise
    # a multiple of 128 sized so that target/budget hold at `row_align` rows.
    by_target = max(1, target_block_bytes // (row_align * itemsize))
    by_budget = max(1, vmem_budget_bytes // (4 * row_align * itemsize) - _LANE)
    max_lanes = max(_LANE, (min(by_target, by_budget) // _LANE) * _LANE)
    if lanes <= max_lanes:
        block_lanes = lanes          # full extent
    else:
        block_lanes = max_lanes      # multiple of 128; ragged tail block masked

    # ---- row (sublane) block ---------------------------------------------
    # Grow toward target_block_bytes while the double-buffered in + out +
    # lane-padded tau footprint stays inside the VMEM budget.
    bl_pad = _lane_pad(block_lanes)
    by_target = max(1, target_block_bytes // (bl_pad * itemsize))
    by_budget = max(1, vmem_budget_bytes // (2 * (2 * bl_pad + _LANE) * itemsize))
    br = min(rows, by_target, by_budget)
    if br >= rows:
        block_rows = rows            # full extent: always legal
    else:
        block_rows = max(row_align, (br // row_align) * row_align)

    # ---- v7x megacore: need >=2 grid steps for "parallel" axes to actually
    # shard across the two TensorCores; only bother for non-trivial tensors.
    if rows * lanes * itemsize >= megacore_min_bytes:
        n_steps = pl.cdiv(rows, block_rows) * pl.cdiv(lanes, block_lanes)
        if n_steps < 2:
            if rows >= 2 * row_align:
                block_rows = max(row_align,
                                 (pl.cdiv(rows, 2) // row_align) * row_align)
            elif lanes % _LANE == 0 and block_lanes >= 2 * _LANE:
                block_lanes = max(_LANE,
                                  (pl.cdiv(block_lanes, 2) // _LANE) * _LANE)

    return block_rows, block_lanes


def tlu_forward(x_nchw: jax.Array, tau: jax.Array, *,
                target_block_bytes: int = 2 * 1024 * 1024,
                vmem_budget_bytes: int = 12 * 1024 * 1024,
                megacore_min_bytes: int = 2 * 1024 * 1024) -> jax.Array:
    """Applies TLU: max(x, tau) with tau broadcast per-channel (NCHW semantics)."""
    n, c, h, w = x_nchw.shape
    assert tau.shape == (c,), "tau must have shape (in_ch,)"

    rows = n * c
    lanes = h * w

    # Free reshape (no transpose, no copy): contiguous H*W is the lane axis.
    x_flat = x_nchw.reshape(rows, lanes)

    # Per-row threshold: row r = n*C + ch  ->  tau[ch].  Tiny (rows, 1) array.
    tau_rows = jnp.broadcast_to(
        tau.astype(x_flat.dtype)[None, :], (n, c)).reshape(rows, 1)

    block_rows, block_lanes = _choose_blocks(
        rows, lanes, x_flat.dtype.itemsize,
        target_block_bytes, vmem_budget_bytes, megacore_min_bytes)

    grid = (pl.cdiv(rows, block_rows), pl.cdiv(lanes, block_lanes))

    out_flat = pl.pallas_call(
        _tlu_kernel,
        out_shape=jax.ShapeDtypeStruct((rows, lanes), x_flat.dtype),
        grid_spec=pltpu.PrefetchScalarGridSpec(
            num_scalar_prefetch=0,
            grid=grid,
            in_specs=[
                pl.BlockSpec((block_rows, block_lanes), lambda i, j: (i, j)),
                pl.BlockSpec((block_rows, 1), lambda i, j: (i, 0)),
            ],
            out_specs=pl.BlockSpec((block_rows, block_lanes), lambda i, j: (i, j)),
        ),
        compiler_params=pltpu.CompilerParams(
            # Both axes write disjoint output blocks -> shard across TCs (v7x).
            dimension_semantics=("parallel", "parallel"),
        ),
    )(x_flat, tau_rows)

    # Free reshape back to NCHW.
    return out_flat.reshape(n, c, h, w)


def _reference(x, tau):
    c = x.shape[1]
    return jnp.maximum(x, tau.astype(x.dtype).reshape(1, c, 1, 1))


if __name__ == "__main__":
    key = jax.random.PRNGKey(0)
    kx, ktau, kx2, kx3, kx4, kx5 = jax.random.split(key, 6)

    # 1) Base case (module-implied shapes): NCHW activations, per-channel tau.
    N, C, H, W = 2, 4, 16, 16
    x = jax.random.normal(kx, (N, C, H, W), dtype=jnp.float32)
    tau_zero = jnp.zeros((C,), dtype=jnp.float32)       # nn.Parameter init
    tau_rand = jax.random.normal(ktau, (C,), dtype=jnp.float32) * 0.5
    for tau in (tau_zero, tau_rand):
        out = jax.block_until_ready(tlu_forward(x, tau))
        assert out.shape == x.shape and out.dtype == x.dtype
        assert jnp.allclose(out, _reference(x, tau)), "TLU mismatch (base)"

    # 2) Multi-block / ragged rows: rows = 100 not a multiple of block_rows.
    x2 = jax.random.normal(kx2, (25, 4, 16, 16), dtype=jnp.float32)
    tau2 = jax.random.normal(ktau, (4,), dtype=jnp.float32)
    out2 = jax.block_until_ready(
        tlu_forward(x2, tau2, target_block_bytes=16 * 1024))
    assert jnp.allclose(out2, _reference(x2, tau2)), "TLU mismatch (ragged rows)"

    # 3) H*W not a multiple of 128 (common FRN feature-map size): full-extent lanes.
    x3 = jax.random.normal(kx3, (2, 3, 7, 7), dtype=jnp.float32)
    tau3 = jax.random.normal(ktau, (3,), dtype=jnp.float32)
    out3 = jax.block_until_ready(tlu_forward(x3, tau3))
    assert jnp.allclose(out3, _reference(x3, tau3)), "TLU mismatch (H*W % 128 != 0)"

    # 4) bf16 activations: row alignment widens to 16 sublanes (full-extent here).
    x4 = jax.random.normal(kx4, (2, 4, 16, 8), dtype=jnp.bfloat16)
    tau4 = (jax.random.normal(ktau, (4,), dtype=jnp.float32) * 0.5)
    out4 = jax.block_until_ready(tlu_forward(x4, tau4))
    assert out4.dtype == jnp.bfloat16
    assert jnp.array_equal(out4, _reference(x4, tau4)), "TLU mismatch (bf16)"

    # 5) Megacore-split branch: force >=2 grid steps on a small tensor.
    x5 = jax.random.normal(kx5, (8, 4, 16, 16), dtype=jnp.float32)
    tau5 = jax.random.normal(ktau, (4,), dtype=jnp.float32)
    out5 = jax.block_until_ready(tlu_forward(x5, tau5, megacore_min_bytes=1))
    assert jnp.allclose(out5, _reference(x5, tau5)), "TLU mismatch (megacore split)"

    print("KERNEL_OK")
</pallas_src>

<mosaic_0001>
module attributes {stable_mosaic.version = 11 : i64} {
  func.func @_tlu_kernel(%arg0: i32, %arg1: i32, %arg2: memref<8x256xf32, #tpu.memory_space<vmem>>, %arg3: memref<8x1xf32, #tpu.memory_space<vmem>>, %arg4: memref<8x256xf32, #tpu.memory_space<vmem>>) attributes {dimension_semantics = [#tpu.dimension_semantics<parallel>, #tpu.dimension_semantics<parallel>], iteration_bounds = array<i64: 1, 1>, scalar_prefetch = 0 : i64, scratch_operands = 0 : i64, tpu.core_type = #tpu.core_type<tc>, window_params = [{transform_indices = @transform_0, window_bounds = array<i64: 8, 256>}, {transform_indices = @transform_1, window_bounds = array<i64: 8, 1>}, {transform_indices = @transform_2, window_bounds = array<i64: 8, 256>}]} {
    %c0 = arith.constant 0 : index
    %c0_0 = arith.constant 0 : index
    %0 = vector.load %arg2[%c0, %c0_0] : memref<8x256xf32, #tpu.memory_space<vmem>>, vector<8x256xf32>
    %c0_1 = arith.constant 0 : index
    %c0_2 = arith.constant 0 : index
    %1 = vector.load %arg3[%c0_1, %c0_2] : memref<8x1xf32, #tpu.memory_space<vmem>>, vector<8x1xf32>
    %2 = vector.broadcast %1 : vector<8x1xf32> to vector<8x256xf32>
    %3 = arith.maximumf %0, %2 : vector<8x256xf32>
    %c0_3 = arith.constant 0 : index
    %c0_4 = arith.constant 0 : index
    %4 = vector.load %arg4[%c0_3, %c0_4] : memref<8x256xf32, #tpu.memory_space<vmem>>, vector<8x256xf32>
    tpu.vector_store %arg4[%c0_3, %c0_4], %3 {strides = array<i32>} : memref<8x256xf32, #tpu.memory_space<vmem>>, vector<8x256xf32>,
    return
  }
  func.func @transform_0(%arg0: i32, %arg1: i32) -> (i32, i32) {
    %c0_i32 = arith.constant 0 : i32
    return %arg0, %arg1 : i32, i32
  }
  func.func @transform_1(%arg0: i32, %arg1: i32) -> (i32, i32) {
    %c0_i32 = arith.constant 0 : i32
    %c0_i32_0 = arith.constant 0 : i32
    return %arg0, %c0_i32 : i32, i32
  }
  func.func @transform_2(%arg0: i32, %arg1: i32) -> (i32, i32) {
    %c0_i32 = arith.constant 0 : i32
    return %arg0, %arg1 : i32, i32
  }
}

</mosaic_0001>

<bundles_post_ra>
// kernel: tpu_custom_call.1
= control target key start
LH: loop header
LB: loop body
LE: loop exit
PB: predicated region body
PF: predicated region fallthrough
CT: control target
= control target key end

     0   :  { %7 = vsyncpa [#allocation3], 0  ;;  %s148_s0 = inlined_call_operand.hbm [shape: f32[8,256], index: 0, kind: input, shape index: {}]   ;;  %s149_s1 = inlined_call_operand.vmem [shape: f32[8,1], index: 1, kind: input, shape index: {}]   ;;  %s150_s2 = inlined_call_operand.hbm [shape: f32[8,256], index: 2, kind: output, shape index: {}]  }
   0x1   :  { %8 = vsyncpa [#allocation4], 0  ;;  %s103_s9 = smov [#allocation2]   ;;  %s55_s13 = scalar_lea.hbm %s148_s0, 256 }
   0x2   :  { %s15_s10 = sshll.u32 %s103_s9, 4  ;;  %p56_p0 = scmp.ne.s32.totalorder %s148_s0, %s55_s13  ;;  %s16_s10 = int_to_ptr.vmem [resolvable:$true] %s15_s10 }
   0x3   :  { %p59_p1 = scmp.lt.u32.totalorder %s55_s13, %s148_s0 }
   0x5   :  { %p61_p2 = pnand %p59_p1, %p56_p0 }
   0x7   :  { %64 = shalt.err (!%p61_p2)
}
   0x8   :  { %s65_s18 = scalar_lea.vmem %s16_s10, 256  ;;  %p70_p4 = scmp.lt.s32.totalorder %s16_s10, %s16_s10 }
   0x9   :  { %p66_p3 = scmp.ne.s32.totalorder %s16_s10, %s65_s18  ;;  %p71_p5 = scmp.lt.s32.totalorder %s65_s18, %s65_s18 }
   0xb   :  { %p72_p6 = por %p71_p5, %p70_p4 }
   0xd   :  { %p73_p7 = pnand %p72_p6, %p66_p3 }
   0xf   :  { %76 = shalt.err (!%p73_p7)
}
  0x10   :  { %18 = dma.hbm_to_vmem [thread:$0]  %s148_s0, 256, %s16_s10, [#allocation3]  }
  0x11   :  { %99 = dma.done.wait [#allocation3], 256  }
  0x12   :  { %100 = vsyncadd [#allocation3], 4294967040  ;;  %v104_v0 = vmov 0   ;;  %v26_v1 = vld [vmem:[%s149_s1] sm:$0xff]  ;;  %v25_v3 = vld [vmem:[#allocation2 + $0x8] sm:$0xff]  ;;  %s105_s23 = smov [#allocation5]  }
  0x13   :  { %54 = vset.pattern.permute.xlu0 %v104_v0  ;;  %v24_v2 = vld [vmem:[#allocation2] sm:$0xff]  ;;  %s42_s24 = sshll.u32 %s105_s23, 4  ;;  %s43_s24 = int_to_ptr.vmem [resolvable:$true] %s42_s24 }
  0x14   :  { %29 = vperm.xlu0 %54, %v26_v1   ;;  %s77_s0 = scalar_lea.vmem %s43_s24, 256  ;;  %p82_p9 = scmp.lt.s32.totalorder %s43_s24, %s43_s24 }
  0x15   :  { %p78_p8 = scmp.ne.s32.totalorder %s43_s24, %s77_s0  ;;  %p83_p10 = scmp.lt.s32.totalorder %s77_s0, %s77_s0 }
  0x17   :  { %p84_p11 = por %p83_p10, %p82_p9 }
  0x19   :  { %p85_p12 = pnand %p84_p11, %p78_p8 }
  0x93   :  { %v30_v4 = vpop.permute.xlu0 %29 }
  0x94   :  { %v32_v5 = vmax.f32 %v24_v2, %v30_v4  ;;  %v33_v6 = vmax.f32 %v25_v3, %v30_v4 }
  0x96   :  { %34 = vst [vmem:[#allocation5] sm:$0xff] %v32_v5  ;;  %35 = vst [vmem:[#allocation5 + $0x8] sm:$0xff] %v33_v6 }
  0x97   :  { %88 = shalt.err (!%p85_p12)
}
  0x98   :  { %s89_s26 = scalar_lea.hbm %s150_s2, 256 }
  0x99   :  { %p90_p13 = scmp.ne.s32.totalorder %s150_s2, %s89_s26  ;;  %p93_p0 = scmp.lt.u32.totalorder %s89_s26, %s150_s2 }
  0x9b   :  { %p95_p1 = pnand %p93_p0, %p90_p13 }
  0x9d   :  { %98 = shalt.err (!%p95_p1)
}
  0x9e   :  { %45 = dma.vmem_to_hbm [thread:$0]  %s43_s24, 256, %s150_s2, [#allocation4]  }
  0x9f   :  { %101 = dma.done.wait [#allocation4], 256  }
  0xa0   :  { %102 = vsyncadd [#allocation4], 4294967040 }
  0xa1   :  { %49 = vsyncpa [#allocation3], 1 }
  0xa2   :  { %50 = vsyncpa [#allocation4], 1 }

</bundles_post_ra>
